<compile_context>
chip_gen: v5e
topology: v5e:2x2
jax: 0.10.0
libtpu: 0.0.40
codegen_flags: <defaults>
</compile_context>

<pallas_src>
import functools

import jax
import jax.numpy as jnp
from jax.experimental import pallas as pl
from jax.experimental.pallas import tpu as pltpu


# -----------------------------------------------------------------------------
# Tile planning helpers (dtype-aware, padding-aware).
# -----------------------------------------------------------------------------
def _round_up(x, m):
    return (x + m - 1) // m * m


def _largest_divisor_tile(hwp, max_lanes):
    """Largest multiple of 128 that divides hwp and is <= max_lanes.
    hwp is a multiple of 128, so the search always succeeds at >= 128."""
    t = min(max_lanes, hwp)
    t = max(128, t // 128 * 128)
    while hwp % t != 0:
        t -= 128
    return t


def _plan_tiles(hw, bc, rb, itemsize, pass1_block_bytes, pass3_block_bytes):
    """Return (hw_padded, tile1, tile3); both tiles are multiples of 128 that
    divide hw_padded.  hw_padded >= hw (zero padding, sliced off later)."""
    hwp = _round_up(hw, 128)
    # Pass 3 budget: (bc, tile3) block, 2 inputs + 2 outputs double-buffered.
    target3 = max(128, (pass3_block_bytes // (bc * itemsize)) // 128 * 128)
    tile3 = _largest_divisor_tile(hwp, target3)
    want3 = min(target3, hwp)
    if tile3 * 2 < want3:
        # hwp has no decent 128-multiple divisor: pad up to a multiple of the
        # target tile instead of degenerating to tiny tiles.
        tile3 = want3
        hwp = _round_up(hwp, tile3)
    # Pass 1 budget: (rb, tile1) block, only 2 inputs double-buffered,
    # so it can take a much larger tile under the same VMEM budget.
    target1 = max(128, (pass1_block_bytes // (rb * itemsize)) // 128 * 128)
    tile1 = _largest_divisor_tile(hwp, target1)
    return hwp, tile1, tile3


# -----------------------------------------------------------------------------
# Fused small-HW kernel: reduce -> attention -> softmax -> scale, one launch.
# -----------------------------------------------------------------------------
def _fused_kernel(temp_ref, color_ref, bright_ref, cout_ref, bout_ref,
                  *, inv_hw, sqrt_c):
    """temp_ref: SMEM (1,1) f32; color/bright: VMEM (B, C, HW) full arrays."""
    cf = color_ref[...].astype(jnp.float32)          # (B, C, HW)
    bf = bright_ref[...].astype(jnp.float32)

    cd = jnp.sum(cf, axis=-1) * inv_hw                # (B, C) spatial means
    bd = jnp.sum(bf, axis=-1) * inv_hw

    inv_scale = 1.0 / (sqrt_c * temp_ref[0, 0])

    # B == C is tiny, so the (B,C)x(C,B) contraction runs on the VPU.
    def cross_logits(a, b):
        return jnp.sum(a[:, None, :] * b[None, :, :], axis=-1) * inv_scale  # (B,B)

    def softmax_lastdim(x):
        m = jnp.max(x, axis=-1, keepdims=True)
        e = jnp.exp(x - m)
        return e / jnp.sum(e, axis=-1, keepdims=True)

    ca = softmax_lastdim(cross_logits(cd, bd))        # (B, B) == (B, C)
    ba = softmax_lastdim(cross_logits(bd, cd))

    cout_ref[...] = (cf * ca[:, :, None]).astype(cout_ref.dtype)
    bout_ref[...] = (bf * ba[:, :, None]).astype(bout_ref.dtype)


# -----------------------------------------------------------------------------
# Pass 1: per-(b,c)-row spatial sums, tiled over HW, row-split for megacore.
# -----------------------------------------------------------------------------
def _descriptor_sum_kernel(color_ref, bright_ref, csum_ref, bsum_ref):
    """color/bright: VMEM (rb, T1) tiles; csum/bsum: VMEM (rb, 1) f32
    accumulators (same output block across the HW grid axis)."""
    @pl.when(pl.program_id(1) == 0)
    def _():
        csum_ref[...] = jnp.zeros_like(csum_ref)
        bsum_ref[...] = jnp.zeros_like(bsum_ref)

    csum_ref[...] += jnp.sum(color_ref[...].astype(jnp.float32),
                             axis=-1, keepdims=True)
    bsum_ref[...] += jnp.sum(bright_ref[...].astype(jnp.float32),
                             axis=-1, keepdims=True)


# -----------------------------------------------------------------------------
# Pass 3: elementwise per-row scaling, tiled + parallel over HW.
# -----------------------------------------------------------------------------
def _scale_kernel(cscale_ref, bscale_ref, color_ref, bright_ref,
                  cout_ref, bout_ref):
    """cscale/bscale: VMEM (BC, 1) f32; color/bright: VMEM (BC, T3) tiles."""
    cs = cscale_ref[...]
    bs = bscale_ref[...]
    if jnp.dtype(cout_ref.dtype) == jnp.dtype(jnp.float32):
        cout_ref[...] = (color_ref[...].astype(jnp.float32) * cs
                         ).astype(cout_ref.dtype)
        bout_ref[...] = (bright_ref[...].astype(jnp.float32) * bs
                         ).astype(bout_ref.dtype)
    else:
        # bf16/fp16 path: multiply in the I/O dtype (halves vreg pressure).
        cout_ref[...] = color_ref[...] * cs.astype(cout_ref.dtype)
        bout_ref[...] = bright_ref[...] * bs.astype(bout_ref.dtype)


# -----------------------------------------------------------------------------
# Wrapper
# -----------------------------------------------------------------------------
def channel_cross_modal_attention(color, brightness, temperature_param, *,
                                  donate_inputs=False,
                                  fused_vmem_budget=12 * 1024 * 1024,
                                  pass1_block_bytes=6 * 1024 * 1024,
                                  pass3_block_bytes=2 * 1024 * 1024):
    """color, brightness: (B, C, H, W) arrays (NCHW, matching PyTorch)."""
    B, C, H, W = color.shape
    assert brightness.shape == color.shape
    assert B == C, "torch .view(B, C, 1, 1) of a (B, B) tensor requires C == B"
    HW = H * W
    BC = B * C
    dtype = color.dtype  # I/O dtype preserved (bf16 inputs stay bf16 on HBM)
    itemsize = jnp.dtype(dtype).itemsize
    inv_hw = float(1.0 / HW)
    sqrt_c = float(C) ** 0.5

    temp = jnp.asarray(temperature_param, jnp.float32).reshape(1, 1)

    # ---- fused single-launch path for small HW -------------------------------
    cpad = _round_up(C, max(8, 32 // itemsize))     # sublane-padded channel dim
    hw_lane = _round_up(HW, 128)
    slab = B * cpad * hw_lane
    fused_bytes = 4 * slab * itemsize
    if jnp.dtype(dtype) != jnp.dtype(jnp.float32):
        fused_bytes += 2 * slab * 4                 # f32 temps inside the kernel
    if fused_bytes <= fused_vmem_budget:
        c3 = color.reshape(B, C, HW)
        b3 = brightness.reshape(B, C, HW)
        kern = functools.partial(_fused_kernel, inv_hw=inv_hw, sqrt_c=sqrt_c)
        c_out, b_out = pl.pallas_call(
            kern,
            grid=(1,),
            out_shape=(
                jax.ShapeDtypeStruct((B, C, HW), dtype),
                jax.ShapeDtypeStruct((B, C, HW), dtype),
            ),
            in_specs=[
                pl.BlockSpec(memory_space=pltpu.MemorySpace.SMEM),  # temperature
                pl.BlockSpec((B, C, HW), lambda i: (0, 0, 0)),
                pl.BlockSpec((B, C, HW), lambda i: (0, 0, 0)),
            ],
            out_specs=(
                pl.BlockSpec((B, C, HW), lambda i: (0, 0, 0)),
                pl.BlockSpec((B, C, HW), lambda i: (0, 0, 0)),
            ),
            compiler_params=pltpu.CompilerParams(
                dimension_semantics=("arbitrary",),
                vmem_limit_bytes=48 << 20),
        )(temp, c3, b3)
        return c_out.reshape(B, C, H, W), b_out.reshape(B, C, H, W)

    # ---- streaming path for large HW -----------------------------------------
    rb = 8 if (BC % 8 == 0) else BC                  # row block (megacore split)
    hwp, tile1, tile3 = _plan_tiles(HW, BC, rb, itemsize,
                                    pass1_block_bytes, pass3_block_bytes)

    c2 = color.reshape(BC, HW)
    b2 = brightness.reshape(BC, HW)
    if hwp != HW:
        pad = hwp - HW
        c2 = jnp.pad(c2, ((0, 0), (0, pad)))         # zeros: harmless to sums
        b2 = jnp.pad(b2, ((0, 0), (0, pad)))

    # pass 1: descriptor sums (reduction over HW tiles, parallel over rows)
    num_r = BC // rb
    num_t1 = hwp // tile1
    csum, bsum = pl.pallas_call(
        _descriptor_sum_kernel,
        grid=(num_r, num_t1),
        out_shape=(
            jax.ShapeDtypeStruct((BC, 1), jnp.float32),
            jax.ShapeDtypeStruct((BC, 1), jnp.float32),
        ),
        in_specs=[
            pl.BlockSpec((rb, tile1), lambda r, t: (r, t)),
            pl.BlockSpec((rb, tile1), lambda r, t: (r, t)),
        ],
        out_specs=(
            pl.BlockSpec((rb, 1), lambda r, t: (r, 0)),
            pl.BlockSpec((rb, 1), lambda r, t: (r, 0)),
        ),
        compiler_params=pltpu.CompilerParams(
            dimension_semantics=("parallel", "arbitrary"),
            vmem_limit_bytes=48 << 20),
    )(c2, b2)

    # tiny (B, B) attention + softmax in plain JAX (no pallas launch needed)
    cd = csum.reshape(B, C) * inv_hw
    bd = bsum.reshape(B, C) * inv_hw
    scale = sqrt_c * temp[0, 0]
    c_attn = jax.nn.softmax((cd @ bd.T) / scale, axis=-1)
    b_attn = jax.nn.softmax((bd @ cd.T) / scale, axis=-1)
    # .view(B, C, 1, 1) of the (B, B) attention (valid because C == B):
    c_scale = c_attn.reshape(BC, 1)
    b_scale = b_attn.reshape(BC, 1)

    # pass 3: elementwise per-row scaling
    num_t3 = hwp // tile3
    aliases = {2: 0, 3: 1} if donate_inputs else {}
    c_out2, b_out2 = pl.pallas_call(
        _scale_kernel,
        grid=(num_t3,),
        out_shape=(
            jax.ShapeDtypeStruct((BC, hwp), dtype),
            jax.ShapeDtypeStruct((BC, hwp), dtype),
        ),
        in_specs=[
            pl.BlockSpec((BC, 1), lambda t: (0, 0)),
            pl.BlockSpec((BC, 1), lambda t: (0, 0)),
            pl.BlockSpec((BC, tile3), lambda t: (0, t)),
            pl.BlockSpec((BC, tile3), lambda t: (0, t)),
        ],
        out_specs=(
            pl.BlockSpec((BC, tile3), lambda t: (0, t)),
            pl.BlockSpec((BC, tile3), lambda t: (0, t)),
        ),
        input_output_aliases=aliases,
        compiler_params=pltpu.CompilerParams(
            dimension_semantics=("parallel",),
            vmem_limit_bytes=48 << 20),
    )(c_scale, b_scale, c2, b2)

    if hwp != HW:
        c_out2 = c_out2[:, :HW]
        b_out2 = b_out2[:, :HW]
    return c_out2.reshape(B, C, H, W), b_out2.reshape(B, C, H, W)


def _reference(color, brightness, temperature_param):
    """Pure-JAX mirror of the PyTorch forward (eval mode)."""
    B, C, H, W = color.shape
    cd = color.astype(jnp.float32).mean(axis=(2, 3))       # (B, C)
    bd = brightness.astype(jnp.float32).mean(axis=(2, 3))  # (B, C)
    scale = (C ** 0.5) * temperature_param
    ca = jax.nn.softmax((cd @ bd.T) / scale, axis=-1).reshape(B, C, 1, 1)
    ba = jax.nn.softmax((bd @ cd.T) / scale, axis=-1).reshape(B, C, 1, 1)
    return color * ca, brightness * ba


if __name__ == "__main__":
    key = jax.random.PRNGKey(0)
    k_color, k_bright, k_c2, k_b2 = jax.random.split(key, 4)

    # Module constraint: C must equal B for the .view(B, C, 1, 1) to be valid.
    B, C, H, W = 4, 4, 16, 16
    color = jax.random.normal(k_color, (B, C, H, W), dtype=jnp.float32)
    brightness = jax.random.normal(k_bright, (B, C, H, W), dtype=jnp.float32)

    # Deterministic parameter init: nn.Parameter(torch.ones(1))
    temperature_param = 1.0

    ref_c, ref_b = _reference(color, brightness, temperature_param)

    # 1) Default dispatch: fused single-launch path (small HW).
    c_out, b_out = channel_cross_modal_attention(
        color, brightness, temperature_param)
    jax.block_until_ready((c_out, b_out))
    assert jnp.allclose(c_out, ref_c, atol=1e-5, rtol=1e-5)
    assert jnp.allclose(b_out, ref_b, atol=1e-5, rtol=1e-5)

    # 2) Forced streaming path with tiny budgets: exercises the megacore-split
    #    accumulating reduction grid (2 row blocks x 2 HW tiles) and the
    #    parallel scale grid (2 HW tiles).
    c_out2, b_out2 = channel_cross_modal_attention(
        color, brightness, temperature_param,
        fused_vmem_budget=0,
        pass1_block_bytes=8 * 128 * 4,
        pass3_block_bytes=16 * 128 * 4)
    jax.block_until_ready((c_out2, b_out2))
    assert jnp.allclose(c_out2, ref_c, atol=1e-5, rtol=1e-5)
    assert jnp.allclose(b_out2, ref_b, atol=1e-5, rtol=1e-5)

    # 3) Non-128-multiple H*W (15x15 = 225): exercises the zero-padding path
    #    on both the fused and the streaming variants.
    H2 = W2 = 15
    color_o = jax.random.normal(k_c2, (B, C, H2, W2), dtype=jnp.float32)
    bright_o = jax.random.normal(k_b2, (B, C, H2, W2), dtype=jnp.float32)
    ref_c3, ref_b3 = _reference(color_o, bright_o, temperature_param)
    c_out3, b_out3 = channel_cross_modal_attention(
        color_o, bright_o, temperature_param)
    c_out4, b_out4 = channel_cross_modal_attention(
        color_o, bright_o, temperature_param, fused_vmem_budget=0)
    jax.block_until_ready((c_out3, b_out3, c_out4, b_out4))
    assert jnp.allclose(c_out3, ref_c3, atol=1e-5, rtol=1e-5)
    assert jnp.allclose(b_out3, ref_b3, atol=1e-5, rtol=1e-5)
    assert jnp.allclose(c_out4, ref_c3, atol=1e-5, rtol=1e-5)
    assert jnp.allclose(b_out4, ref_b3, atol=1e-5, rtol=1e-5)

    print("KERNEL_OK")
</pallas_src>

<mosaic_0001>
module attributes {stable_mosaic.version = 11 : i64} {
  func.func @_fused_kernel(%arg0: i32, %arg1: memref<1x1xf32, #tpu.memory_space<smem>>, %arg2: memref<4x4x256xf32, #tpu.memory_space<vmem>>, %arg3: memref<4x4x256xf32, #tpu.memory_space<vmem>>, %arg4: memref<4x4x256xf32, #tpu.memory_space<vmem>>, %arg5: memref<4x4x256xf32, #tpu.memory_space<vmem>>) attributes {dimension_semantics = [#tpu.dimension_semantics<arbitrary>], iteration_bounds = array<i64: 1>, scalar_prefetch = 0 : i64, scratch_operands = 0 : i64, tpu.core_type = #tpu.core_type<tc>, window_params = [{transform_indices = @transform_0, window_bounds = array<i64: 1, 1>}, {pipeline_mode = #tpu.pipeline_mode<synchronous>, transform_indices = @transform_1, window_bounds = array<i64: 4, 4, 256>}, {pipeline_mode = #tpu.pipeline_mode<synchronous>, transform_indices = @transform_2, window_bounds = array<i64: 4, 4, 256>}, {pipeline_mode = #tpu.pipeline_mode<synchronous>, transform_indices = @transform_3, window_bounds = array<i64: 4, 4, 256>}, {pipeline_mode = #tpu.pipeline_mode<synchronous>, transform_indices = @transform_4, window_bounds = array<i64: 4, 4, 256>}]} {
    %c0 = arith.constant 0 : index
    %c0_0 = arith.constant 0 : index
    %c0_1 = arith.constant 0 : index
    %0 = vector.load %arg2[%c0, %c0_0, %c0_1] : memref<4x4x256xf32, #tpu.memory_space<vmem>>, vector<4x4x256xf32>
    %c0_2 = arith.constant 0 : index
    %c0_3 = arith.constant 0 : index
    %c0_4 = arith.constant 0 : index
    %1 = vector.load %arg3[%c0_2, %c0_3, %c0_4] : memref<4x4x256xf32, #tpu.memory_space<vmem>>, vector<4x4x256xf32>
    %cst = arith.constant dense<0.000000e+00> : vector<4x4xf32>
    %2 = vector.multi_reduction <add>, %0, %cst [2] : vector<4x4x256xf32> to vector<4x4xf32>
    %cst_5 = arith.constant 3.906250e-03 : f32
    %3 = vector.broadcast %cst_5 : f32 to vector<4x4xf32>
    %4 = arith.mulf %2, %3 : vector<4x4xf32>
    %cst_6 = arith.constant dense<0.000000e+00> : vector<4x4xf32>
    %5 = vector.multi_reduction <add>, %1, %cst_6 [2] : vector<4x4x256xf32> to vector<4x4xf32>
    %cst_7 = arith.constant 3.906250e-03 : f32
    %6 = vector.broadcast %cst_7 : f32 to vector<4x4xf32>
    %7 = arith.mulf %5, %6 : vector<4x4xf32>
    %c0_8 = arith.constant 0 : index
    %c0_9 = arith.constant 0 : index
    %8 = memref.load %arg1[%c0_8, %c0_9] : memref<1x1xf32, #tpu.memory_space<smem>>
    %cst_10 = arith.constant 2.000000e+00 : f32
    %9 = arith.mulf %cst_10, %8 : f32
    %cst_11 = arith.constant 1.000000e+00 : f32
    %10 = arith.divf %cst_11, %9 : f32
    %11 = vector.shape_cast %4 : vector<4x4xf32> to vector<4x1x4xf32>
    %12 = vector.shape_cast %7 : vector<4x4xf32> to vector<1x4x4xf32>
    %13 = vector.broadcast %11 : vector<4x1x4xf32> to vector<4x4x4xf32>
    %14 = vector.broadcast %12 : vector<1x4x4xf32> to vector<4x4x4xf32>
    %15 = arith.mulf %13, %14 : vector<4x4x4xf32>
    %cst_12 = arith.constant dense<0.000000e+00> : vector<4x4xf32>
    %16 = vector.multi_reduction <add>, %15, %cst_12 [2] : vector<4x4x4xf32> to vector<4x4xf32>
    %17 = vector.broadcast %10 : f32 to vector<4x4xf32>
    %18 = arith.mulf %16, %17 : vector<4x4xf32>
    %cst_13 = arith.constant dense<0xFF800000> : vector<4xf32>
    %19 = vector.multi_reduction <maximumf>, %18, %cst_13 [1] : vector<4x4xf32> to vector<4xf32>
    %20 = vector.shape_cast %19 : vector<4xf32> to vector<4x1xf32>
    %21 = vector.broadcast %20 : vector<4x1xf32> to vector<4x4xf32>
    %22 = arith.subf %18, %21 : vector<4x4xf32>
    %23 = math.exp %22 : vector<4x4xf32>
    %cst_14 = arith.constant dense<0.000000e+00> : vector<4xf32>
    %24 = vector.multi_reduction <add>, %23, %cst_14 [1] : vector<4x4xf32> to vector<4xf32>
    %25 = vector.shape_cast %24 : vector<4xf32> to vector<4x1xf32>
    %26 = vector.broadcast %25 : vector<4x1xf32> to vector<4x4xf32>
    %27 = arith.divf %23, %26 : vector<4x4xf32>
    %28 = vector.shape_cast %7 : vector<4x4xf32> to vector<4x1x4xf32>
    %29 = vector.shape_cast %4 : vector<4x4xf32> to vector<1x4x4xf32>
    %30 = vector.broadcast %28 : vector<4x1x4xf32> to vector<4x4x4xf32>
    %31 = vector.broadcast %29 : vector<1x4x4xf32> to vector<4x4x4xf32>
    %32 = arith.mulf %30, %31 : vector<4x4x4xf32>
    %cst_15 = arith.constant dense<0.000000e+00> : vector<4x4xf32>
    %33 = vector.multi_reduction <add>, %32, %cst_15 [2] : vector<4x4x4xf32> to vector<4x4xf32>
    %34 = vector.broadcast %10 : f32 to vector<4x4xf32>
    %35 = arith.mulf %33, %34 : vector<4x4xf32>
    %cst_16 = arith.constant dense<0xFF800000> : vector<4xf32>
    %36 = vector.multi_reduction <maximumf>, %35, %cst_16 [1] : vector<4x4xf32> to vector<4xf32>
    %37 = vector.shape_cast %36 : vector<4xf32> to vector<4x1xf32>
    %38 = vector.broadcast %37 : vector<4x1xf32> to vector<4x4xf32>
    %39 = arith.subf %35, %38 : vector<4x4xf32>
    %40 = math.exp %39 : vector<4x4xf32>
    %cst_17 = arith.constant dense<0.000000e+00> : vector<4xf32>
    %41 = vector.multi_reduction <add>, %40, %cst_17 [1] : vector<4x4xf32> to vector<4xf32>
    %42 = vector.shape_cast %41 : vector<4xf32> to vector<4x1xf32>
    %43 = vector.broadcast %42 : vector<4x1xf32> to vector<4x4xf32>
    %44 = arith.divf %40, %43 : vector<4x4xf32>
    %45 = vector.shape_cast %27 : vector<4x4xf32> to vector<4x4x1xf32>
    %46 = vector.broadcast %45 : vector<4x4x1xf32> to vector<4x4x256xf32>
    %47 = arith.mulf %0, %46 : vector<4x4x256xf32>
    %c0_18 = arith.constant 0 : index
    %c0_19 = arith.constant 0 : index
    %c0_20 = arith.constant 0 : index
    %48 = vector.load %arg4[%c0_18, %c0_19, %c0_20] : memref<4x4x256xf32, #tpu.memory_space<vmem>>, vector<4x4x256xf32>
    tpu.vector_store %arg4[%c0_18, %c0_19, %c0_20], %47 {strides = array<i32>} : memref<4x4x256xf32, #tpu.memory_space<vmem>>, vector<4x4x256xf32>,
    %49 = vector.shape_cast %44 : vector<4x4xf32> to vector<4x4x1xf32>
    %50 = vector.broadcast %49 : vector<4x4x1xf32> to vector<4x4x256xf32>
    %51 = arith.mulf %1, %50 : vector<4x4x256xf32>
    %c0_21 = arith.constant 0 : index
    %c0_22 = arith.constant 0 : index
    %c0_23 = arith.constant 0 : index
    %52 = vector.load %arg5[%c0_21, %c0_22, %c0_23] : memref<4x4x256xf32, #tpu.memory_space<vmem>>, vector<4x4x256xf32>
    tpu.vector_store %arg5[%c0_21, %c0_22, %c0_23], %51 {strides = array<i32>} : memref<4x4x256xf32, #tpu.memory_space<vmem>>, vector<4x4x256xf32>,
    return
  }
  func.func @transform_0(%arg0: i32) -> (i32, i32) {
    %c0_i32 = arith.constant 0 : i32
    %c0_i32_0 = arith.constant 0 : i32
    %c0_i32_1 = arith.constant 0 : i32
    return %c0_i32, %c0_i32_0 : i32, i32
  }
  func.func @transform_1(%arg0: i32) -> (i32, i32, i32) {
    %c0_i32 = arith.constant 0 : i32
    %c0_i32_0 = arith.constant 0 : i32
    %c0_i32_1 = arith.constant 0 : i32
    %c0_i32_2 = arith.constant 0 : i32
    return %c0_i32, %c0_i32_0, %c0_i32_1 : i32, i32, i32
  }
  func.func @transform_2(%arg0: i32) -> (i32, i32, i32) {
    %c0_i32 = arith.constant 0 : i32
    %c0_i32_0 = arith.constant 0 : i32
    %c0_i32_1 = arith.constant 0 : i32
    %c0_i32_2 = arith.constant 0 : i32
    return %c0_i32, %c0_i32_0, %c0_i32_1 : i32, i32, i32
  }
  func.func @transform_3(%arg0: i32) -> (i32, i32, i32) {
    %c0_i32 = arith.constant 0 : i32
    %c0_i32_0 = arith.constant 0 : i32
    %c0_i32_1 = arith.constant 0 : i32
    %c0_i32_2 = arith.constant 0 : i32
    return %c0_i32, %c0_i32_0, %c0_i32_1 : i32, i32, i32
  }
  func.func @transform_4(%arg0: i32) -> (i32, i32, i32) {
    %c0_i32 = arith.constant 0 : i32
    %c0_i32_0 = arith.constant 0 : i32
    %c0_i32_1 = arith.constant 0 : i32
    %c0_i32_2 = arith.constant 0 : i32
    return %c0_i32, %c0_i32_0, %c0_i32_1 : i32, i32, i32
  }
}

</mosaic_0001>

<bundles_post_ra>
// kernel: tpu_custom_call.1
= control target key start
LH: loop header
LB: loop body
LE: loop exit
PB: predicated region body
PF: predicated region fallthrough
CT: control target
= control target key end

     0   :  { %11 = vsyncpa [#allocation4], 0  ;;  %s1114_s0 = inlined_call_operand.<no memory space> [shape: f32[1,1], index: 0, kind: input, shape index: {}]   ;;  %s1115_s1 = inlined_call_operand.hbm [shape: f32[4,4,256], index: 1, kind: input, shape index: {}]   ;;  %s1116_s2 = inlined_call_operand.hbm [shape: f32[4,4,256], index: 2, kind: input, shape index: {}]   ;;  %s1117_s3 = inlined_call_operand.hbm [shape: f32[4,4,256], index: 3, kind: output, shape index: {0}]   ;;  %s1118_s4 = inlined_call_operand.hbm [shape: f32[4,4,256], index: 4, kind: output, shape index: {1}]  }
   0x1   :  { %12 = vsyncpa [#allocation7], 0 }
   0x2   :  { %13 = vsyncpa [#allocation5], 0 }
   0x3   :  { %14 = vsyncpa [#allocation10], 0  ;;  %s21_s17 = sshll.u32 %s1115_s1, 4  ;;  %s840_s18 = smov [#allocation3]   ;;  %s22_s17 = int_to_ptr.hbm [resolvable:$true] %s21_s17 }
   0x4   :  { %s23_s19 = sshll.u32 %s840_s18, 4  ;;  %s34_s22 = sshll.u32 %s1116_s2, 4  ;;  %s24_s19 = int_to_ptr.vmem [resolvable:$true] %s23_s19  ;;  %s35_s22 = int_to_ptr.hbm [resolvable:$true] %s34_s22 }
   0x5   :  { %s841_s23 = smov 128   ;;  %s842_s24 = smov 8  }
   0x6   :  { %29 = dma.hbm_to_vmem [thread:$0]  %s22_s17, 512, %s24_s19, [#allocation4], %s841_s23, %s841_s23, %s842_s24  }
   0x7   :  { %s843_s25 = smov [#allocation6]  }
   0x8   :  { %s36_s26 = sshll.u32 %s843_s25, 4  ;;  %s37_s26 = int_to_ptr.vmem [resolvable:$true] %s36_s26 }
   0x9   :  { %42 = dma.hbm_to_vmem [thread:$0]  %s35_s22, 512, %s37_s26, [#allocation7], %s841_s23, %s841_s23, %s842_s24  }
   0xa   :  { %832 = dma.done.wait [#allocation4], 512  }
   0xb   :  { %833 = vsyncadd [#allocation4], 4294966784 }
   0xc   :  { %834 = dma.done.wait [#allocation7], 512  }
   0xd   :  { %835 = vsyncadd [#allocation7], 4294966784  ;;  %v885_v0 = vld [vmem:[#allocation3] sm:$0xff]  ;;  %v887_v1 = vld [vmem:[#allocation3 + $0x10] sm:$0xff]  ;;  %vm86_vm0 = vcmask 1043456   ;;  %v212_v51 = vlaneseq  ;;  %s163_s27 = smul.f32 2.0, %s1114_s0 }
   0xe   :  { %63 = vst [vmem:[#allocation1] ss:$2 sm:$0xff] %v885_v0  ;;  %v890_v2 = vld [vmem:[#allocation3 + $0x8] sm:$0xff]  ;;  %v893_v3 = vld [vmem:[#allocation3 + $0x18] sm:$0xff]  ;;  %v897_v4 = vld [vmem:[#allocation6] sm:$0xff]  ;;  %vm230_vm1 = vcmask 1041409  }
   0xf   :  { %71 = vst [vmem:[#allocation1 + $0x20] ss:$2 sm:$0xff] %v887_v1  ;;  %v899_v5 = vld [vmem:[#allocation6 + $0x10] sm:$0xff]  ;;  %v904_v10 = vld [vmem:[#allocation6 + $0x8] sm:$0xff]  ;;  %v909_v16 = vld [vmem:[#allocation6 + $0x18] sm:$0xff]  ;;  %v925_v61 = vand.u32 127, %v212_v51 }
  0x10   :  { %67 = vst [vmem:[#allocation1 + $0x10] ss:$2 sm:$0xff] %v890_v2  ;;  %vm232_vm2 = vcmask 1042434   ;;  %vm234_vm3 = vcmask 1043459   ;;  %vm249_vm4 = vcmask 27648   ;;  %s846_s28 = smov [#allocation8]  }
  0x11   :  { %75 = vst [vmem:[#allocation1 + $0x30] ss:$2 sm:$0xff] %v893_v3  ;;  %s655_s29 = sshll.u32 %s846_s28, 4  ;;  %s657_s6 = sshll.u32 %s1117_s3, 4  ;;  %s656_s29 = int_to_ptr.vmem [resolvable:$true] %s655_s29  ;;  %s658_s6 = int_to_ptr.hbm [resolvable:$true] %s657_s6 }
  0x12   :  { %s847_s7 = smov [#allocation9]   ;;  %s670_s10 = sshll.u32 %s1118_s4, 4  ;;  %s671_s10 = int_to_ptr.hbm [resolvable:$true] %s670_s10 }
  0x13   :  { %s668_s8 = sshll.u32 %s847_s7, 4  ;;  %s669_s8 = int_to_ptr.vmem [resolvable:$true] %s668_s8 }
  0x15   :  { %v64_v6 = vld.sshfl [vmem:[#allocation1] sm:$0xff pattern:$0x75316420]  ;;  %v65_v7 = vld.sshfl [vmem:[#allocation1 + $0x8] sm:$0xff pattern:$0x75316420] }
  0x16   :  { %v87_v8 = vsel %vm86_vm0, %v64_v6, 0.0  ;;  %v88_v9 = vsel %vm86_vm0, %v65_v7, 0.0  ;;  %115 = vst [vmem:[#allocation1] ss:$2 sm:$0xff] %v897_v4 }
  0x17   :  { %v89_v11 = vadd.f32 %v88_v9, %v87_v8  ;;  %v72_v12 = vld.sshfl [vmem:[#allocation1 + $0x20] sm:$0xff pattern:$0x75316420]  ;;  %v73_v13 = vld.sshfl [vmem:[#allocation1 + $0x28] sm:$0xff pattern:$0x75316420] }
  0x18   :  { %v97_v14 = vsel %vm86_vm0, %v72_v12, 0.0  ;;  %v98_v15 = vsel %vm86_vm0, %v73_v13, 0.0  ;;  %123 = vst [vmem:[#allocation1 + $0x20] ss:$2 sm:$0xff] %v899_v5 }
  0x19   :  { %90 = vadd.xlane.f32.xlu0 %v89_v11  ;;  %v99_v17 = vadd.f32 %v98_v15, %v97_v14  ;;  %v68_v18 = vld.sshfl [vmem:[#allocation1 + $0x10] sm:$0xff pattern:$0x75316420]  ;;  %v69_v19 = vld.sshfl [vmem:[#allocation1 + $0x18] sm:$0xff pattern:$0x75316420] }
  0x1a   :  { %v92_v20 = vsel %vm86_vm0, %v68_v18, 0.0  ;;  %v93_v21 = vsel %vm86_vm0, %v69_v19, 0.0  ;;  %119 = vst [vmem:[#allocation1 + $0x10] ss:$2 sm:$0xff] %v904_v10  ;;  %v164_v19 = vstv %s163_s27 }
  0x1b   :  { %100 = vadd.xlane.f32.xlu2 %v99_v17  ;;  %v76_v22 = vld.sshfl [vmem:[#allocation1 + $0x30] sm:$0xff pattern:$0x75316420]  ;;  %v77_v23 = vld.sshfl [vmem:[#allocation1 + $0x38] sm:$0xff pattern:$0x75316420]  ;;  %v94_v26 = vadd.f32 %v93_v21, %v92_v20  ;;  %702 = vrcp.f32 %v164_v19  ;;  %vm170_vm5 = vweird.f32 %v164_v19 }
  0x1c   :  { %127 = vst [vmem:[#allocation1 + $0x30] ss:$2 sm:$0xff] %v909_v16  ;;  %v102_v39 = vsel %vm86_vm0, %v76_v22, 0.0  ;;  %v103_v40 = vsel %vm86_vm0, %v77_v23, 0.0  ;;  %v176_v51 = vand.u32 2147483648, %v164_v19 }
  0x1d   :  { %v116_v24 = vld.sshfl [vmem:[#allocation1] sm:$0xff pattern:$0x75316420]  ;;  %v117_v25 = vld.sshfl [vmem:[#allocation1 + $0x8] sm:$0xff pattern:$0x75316420]  ;;  %v104_v42 = vadd.f32 %v103_v40, %v102_v39 }
  0x1e   :  { %v138_v27 = vsel %vm86_vm0, %v116_v24, 0.0  ;;  %v139_v28 = vsel %vm86_vm0, %v117_v25, 0.0 }
  0x1f   :  { %v140_v29 = vadd.f32 %v139_v28, %v138_v27  ;;  %v124_v30 = vld.sshfl [vmem:[#allocation1 + $0x20] sm:$0xff pattern:$0x75316420]  ;;  %v125_v31 = vld.sshfl [vmem:[#allocation1 + $0x28] sm:$0xff pattern:$0x75316420] }
  0x20   :  { %v148_v32 = vsel %vm86_vm0, %v124_v30, 0.0  ;;  %v149_v33 = vsel %vm86_vm0, %v125_v31, 0.0 }
  0x21   :  { %141 = vadd.xlane.f32.xlu1 %v140_v29  ;;  %95 = vadd.xlane.f32.xlu0 %v94_v26  ;;  %v150_v34 = vadd.f32 %v149_v33, %v148_v32  ;;  %v120_v35 = vld.sshfl [vmem:[#allocation1 + $0x10] sm:$0xff pattern:$0x75316420]  ;;  %v121_v36 = vld.sshfl [vmem:[#allocation1 + $0x18] sm:$0xff pattern:$0x75316420] }
  0x22   :  { %v143_v37 = vsel %vm86_vm0, %v120_v35, 0.0  ;;  %v144_v38 = vsel %vm86_vm0, %v121_v36, 0.0  ;;  %v703_v36 = vpop.eup %702 }
  0x23   :  { %151 = vadd.xlane.f32.xlu2 %v150_v34  ;;  %v145_v41 = vadd.f32 %v144_v38, %v143_v37  ;;  %v128_v43 = vld.sshfl [vmem:[#allocation1 + $0x30] sm:$0xff pattern:$0x75316420]  ;;  %v129_v44 = vld.sshfl [vmem:[#allocation1 + $0x38] sm:$0xff pattern:$0x75316420]  ;;  %vm171_vm6 = vweird.f32 %v703_v36 }
  0x24   :  { %v153_v45 = vsel %vm86_vm0, %v128_v43, 0.0  ;;  %v154_v46 = vsel %vm86_vm0, %v129_v44, 0.0  ;;  %vm172_vm7 = vmor %vm170_vm5, %vm171_vm6 }
  0x25   :  { %v155_v47 = vadd.f32 %v154_v46, %v153_v45  ;;  %v166_v45 = vmul.f32 %v703_v36, %v164_v19  ;;  %v174_v46 = vand.u32 2147483647, %v164_v19 }
  0x27   :  { %vm175_vm8 = vcmp.eq.f32.partialorder %v174_v46, 8.507059e+37 }
  0x29   :  { %146 = vadd.xlane.f32.xlu1 %v145_v41  ;;  %105 = vadd.xlane.f32.xlu0 %v104_v42 }
  0x31   :  { %156 = vadd.xlane.f32.xlu1 %v155_v47 }
  0x8c   :  { %v91_v48 = vpop.xlane.xlu0 %90 }
  0x8d   :  { %v107_v50 = vmul.f32 0.00390625, %v91_v48 }
  0x8e   :  { %v101_v49 = vpop.xlane.xlu2 %100 }
  0x8f   :  { %v109_v56 = vmul.f32 0.00390625, %v101_v49 }
  0x94   :  { %v142_v52 = vpop.xlane.xlu1 %141  ;;  %v96_v53 = vpop.xlane.xlu0 %95 }
  0x95   :  { %v158_v54 = vmul.f32 0.00390625, %v142_v52  ;;  %v108_v55 = vmul.f32 0.00390625, %v96_v53 }
  0x96   :  { %v152_v57 = vpop.xlane.xlu2 %151 }
  0x97   :  { %v180_v58 = vmul.f32 %v158_v54, %v107_v50  ;;  %v184_v59 = vmul.f32 %v158_v54, %v108_v55  ;;  %v160_v60 = vmul.f32 0.00390625, %v152_v57  ;;  %v188_v62 = vmul.f32 %v158_v54, %v109_v56 }
  0x99   :  { %v182_v63 = vmul.f32 %v160_v60, %v107_v50  ;;  %v186_v6 = vmul.f32 %v160_v60, %v108_v55  ;;  %v214_v7 = vperm.slane %v180_v58, %v925_v61  ;;  %v218_v8 = vperm.slane %v184_v59, %v925_v61 }
  0x9a   :  { %v190_v12 = vmul.f32 %v160_v60, %v109_v56  ;;  %v222_v15 = vperm.slane %v188_v62, %v925_v61 }
  0x9b   :  { %v216_v17 = vperm.slane %v182_v63, %v925_v61  ;;  %v220_v18 = vperm.slane %v186_v6, %v925_v61  ;;  %v399_v23 = vsel %vm230_vm1, %v218_v8, %v214_v7 }
  0x9c   :  { %v147_v9 = vpop.xlane.xlu1 %146  ;;  %v106_v11 = vpop.xlane.xlu0 %105  ;;  %v400_v25 = vsel %vm232_vm2, %v222_v15, %v399_v23  ;;  %v224_v27 = vperm.slane %v190_v12, %v925_v61 }
  0x9d   :  { %v159_v13 = vmul.f32 0.00390625, %v147_v9  ;;  %v932_v14 = vmul.f32 0.00390625, %v106_v11  ;;  %v405_v31 = vsel %vm230_vm1, %v220_v18, %v216_v17 }
  0x9e   :  { %v406_v38 = vsel %vm232_vm2, %v224_v27, %v405_v31 }
  0x9f   :  { %v181_v20 = vmul.f32 %v159_v13, %v107_v50  ;;  %v185_v21 = vmul.f32 %v159_v13, %v108_v55  ;;  %v192_v22 = vmul.f32 %v158_v54, %v932_v14  ;;  %v194_v26 = vmul.f32 %v160_v60, %v932_v14 }
  0xa0   :  { %v189_v32 = vmul.f32 %v159_v13, %v109_v56  ;;  %v193_v39 = vmul.f32 %v159_v13, %v932_v14  ;;  %v167_v54 = vsub.f32 1.0, %v166_v45 }
  0xa1   :  { %v940_v24 = vperm.slane %v192_v22, %v925_v61  ;;  %v215_v29 = vperm.slane %v181_v20, %v925_v61  ;;  %v219_v30 = vperm.slane %v185_v21, %v925_v61  ;;  %v228_v37 = vperm.slane %v194_v26, %v925_v61 }
  0xa2   :  { %v223_v44 = vperm.slane %v189_v32, %v925_v61  ;;  %v168_v6 = vmul.f32 %v703_v36, %v167_v54  ;;  %v227_v9 = vperm.slane %v193_v39, %v925_v61 }
  0xa3   :  { %v401_v28 = vsel %vm234_vm3, %v940_v24, %v400_v25  ;;  %v231_v41 = vsel %vm230_vm1, %v215_v29, %v214_v7  ;;  %v236_v43 = vsel %vm230_vm1, %v219_v30, %v218_v8  ;;  %v407_v53 = vsel %vm234_vm3, %v228_v37, %v406_v38 }
  0xa4   :  { %v157_v33 = vpop.xlane.xlu1 %156  ;;  %v415_v34 = vsel %vm249_vm4, %v401_v28, 0.0  ;;  %v233_v52 = vsel %vm232_vm2, %v216_v17, %v231_v41  ;;  %v402_v58 = vsel %vm230_vm1, %v219_v30, %v215_v29  ;;  %v239_v63 = vsel %vm230_vm1, %v223_v44, %v222_v15 }
  0xa5   :  { %v161_v35 = vmul.f32 0.00390625, %v157_v33  ;;  %416 = vadd.xlane.f32.xlu1 %v415_v34  ;;  %v403_v7 = vsel %vm232_vm2, %v223_v44, %v402_v58  ;;  %v177_v8 = vor.u32 1.1754944e-38, %v176_v51  ;;  %v169_v11 = vadd.f32 %v703_v36, %v168_v6 }
  0xa6   :  { %v240_v12 = vsel %vm232_vm2, %v224_v27, %v239_v63  ;;  %v404_v17 = vsel %vm234_vm3, %v227_v9, %v403_v7  ;;  %v242_v25 = vsel %vm230_vm1, %v227_v9, %v940_v24  ;;  %v844_v6 = vmov 0  }
  0xa7   :  { %v183_v40 = vmul.f32 %v161_v35, %v107_v50  ;;  %v187_v42 = vmul.f32 %v161_v35, %v108_v55  ;;  %v191_v49 = vmul.f32 %v161_v35, %v109_v56  ;;  %v237_v50 = vsel %vm232_vm2, %v220_v18, %v236_v43  ;;  %701 = vset.pattern.permute.xlu2 %v844_v6 }
  0xa8   :  { %v421_v56 = vsel %vm249_vm4, %v407_v53, 0.0  ;;  %v195_v18 = vmul.f32 %v161_v35, %v932_v14  ;;  %v173_v15 = vsel %vm172_vm7, %v703_v36, %v169_v11  ;;  %v418_v22 = vsel %vm249_vm4, %v404_v17, 0.0  ;;  %700 = vset.pattern.permute.xlu1 %v844_v6  ;;  %699 = vset.pattern.permute.xlu0 %v844_v6 }
  0xa9   :  { %v217_v47 = vperm.slane %v183_v40, %v925_v61  ;;  %v221_v48 = vperm.slane %v187_v42, %v925_v61  ;;  %v225_v62 = vperm.slane %v191_v49, %v925_v61  ;;  %v178_v20 = vsel %vm175_vm8, %v177_v8, %v173_v15 }
  0xaa   :  { %689 = vpush %v178_v20  ;;  %v229_v23 = vperm.slane %v195_v18, %v925_v61  ;;  %v243_v14 = vsel %vm232_vm2, %v228_v37, %v242_v25 }
  0xab   :  { %v235_v55 = vsel %vm234_vm3, %v217_v47, %v233_v52  ;;  %v238_v57 = vsel %vm234_vm3, %v221_v48, %v237_v50  ;;  %v241_v13 = vsel %vm234_vm3, %v225_v62, %v240_v12  ;;  %v408_v21 = vsel %vm230_vm1, %v221_v48, %v217_v47 }
  0xac   :  { %v250_v59 = vsel %vm249_vm4, %v235_v55, 0.0  ;;  %v253_v60 = vsel %vm249_vm4, %v238_v57, 0.0  ;;  %v256_v19 = vsel %vm249_vm4, %v241_v13, 0.0  ;;  %v409_v26 = vsel %vm232_vm2, %v225_v62, %v408_v21 }
  0xad   :  { %251 = vadd.xlane.f32.xlu2 %v250_v59  ;;  %254 = vadd.xlane.f32.xlu0 %v253_v60  ;;  %v410_v27 = vsel %vm234_vm3, %v229_v23, %v409_v26  ;;  %v244_v28 = vsel %vm234_vm3, %v229_v23, %v243_v14 }
  0xae   :  { %422 = vadd.xlane.f32.xlu1 %v421_v56  ;;  %v424_v29 = vsel %vm249_vm4, %v410_v27, 0.0  ;;  %v259_v30 = vsel %vm249_vm4, %v244_v28, 0.0 }
  0xb5   :  { %257 = vadd.xlane.f32.xlu0 %v256_v19  ;;  %419 = vadd.xlane.f32.xlu2 %v418_v22 }
  0xbd   :  { %425 = vadd.xlane.f32.xlu0 %v424_v29  ;;  %260 = vadd.xlane.f32.xlu2 %v259_v30 }
  0xdb   :  { %s690_s0 = spop %689 }
  0xdc   :  { %v262_v34 = vstv %s690_s0 }
 0x118   :  { %v417_v33 = vpop.xlane.xlu1 %416 }
 0x119   :  { %v427_v38 = vmul.f32 %v417_v33, %v262_v34 }
 0x11b   :  { %v435_v44 = vperm.slane %v427_v38, %v925_v61 }
 0x120   :  { %v252_v31 = vpop.xlane.xlu2 %251  ;;  %v255_v32 = vpop.xlane.xlu0 %254 }
 0x121   :  { %v263_v37 = vmul.f32 %v262_v34, %v252_v31  ;;  %v423_v39 = vpop.xlane.xlu1 %422  ;;  %v264_v40 = vmul.f32 %v262_v34, %v255_v32 }
 0x122   :  { %v429_v43 = vmul.f32 %v423_v39, %v262_v34 }
 0x123   :  { %v271_v45 = vperm.slane %v263_v37, %v925_v61  ;;  %v272_v46 = vperm.slane %v264_v40, %v925_v61 }
 0x124   :  { %v437_v53 = vperm.slane %v429_v43, %v925_v61 }
 0x125   :  { %v275_v57 = vsel %vm230_vm1, %v272_v46, %v271_v45 }
 0x128   :  { %v420_v24 = vpop.xlane.xlu2 %419  ;;  %v258_v35 = vpop.xlane.xlu0 %257 }
 0x129   :  { %v428_v36 = vmul.f32 %v420_v24, %v262_v34  ;;  %v265_v41 = vmul.f32 %v262_v34, %v258_v35 }
 0x12b   :  { %v436_v42 = vperm.slane %v428_v36, %v925_v61  ;;  %v273_v47 = vperm.slane %v265_v41, %v925_v61 }
 0x12d   :  { %v439_v50 = vsel %vm230_vm1, %v436_v42, %v435_v44  ;;  %v276_v58 = vsel %vm232_vm2, %v273_v47, %v275_v57 }
 0x12e   :  { %v440_v59 = vsel %vm232_vm2, %v437_v53, %v439_v50 }
 0x130   :  { %v261_v48 = vpop.xlane.xlu2 %260  ;;  %v426_v49 = vpop.xlane.xlu0 %425 }
 0x131   :  { %v266_v51 = vmul.f32 %v262_v34, %v261_v48  ;;  %v430_v52 = vmul.f32 %v426_v49, %v262_v34 }
 0x133   :  { %v274_v54 = vperm.slane %v266_v51, %v925_v61  ;;  %v438_v55 = vperm.slane %v430_v52, %v925_v61 }
 0x135   :  { %v277_v60 = vsel %vm234_vm3, %v274_v54, %v276_v58  ;;  %v441_v56 = vsel %vm234_vm3, %v438_v55, %v440_v59 }
 0x136   :  { %v279_v62 = vsel %vm249_vm4, %v277_v60, -inf  ;;  %v443_v63 = vsel %vm249_vm4, %v441_v56, -inf }
 0x137   :  { %280 = vmax.xlane.f32.xlu1 %v279_v62  ;;  %444 = vmax.xlane.f32.xlu2 %v443_v63 }
 0x1aa   :  { %v281_v7 = vpop.xlane.xlu1 %280  ;;  %v445_v8 = vpop.xlane.xlu2 %444 }
 0x1ab   :  { %v283_v9 = vperm.slane %v281_v7, 0  ;;  %v284_v11 = vperm.slane %v281_v7, 1  ;;  %v447_v12 = vperm.slane %v445_v8, 0  ;;  %v450_v18 = vperm.slane %v445_v8, 3 }
 0x1ac   :  { %v285_v15 = vperm.slane %v281_v7, 2  ;;  %v448_v22 = vperm.slane %v445_v8, 1  ;;  %v286_v28 = vperm.slane %v281_v7, 3  ;;  %v449_v32 = vperm.slane %v445_v8, 2 }
 0x1ad   :  { %v291_v13 = vsub.f32 %v263_v37, %v283_v9  ;;  %v292_v17 = vsub.f32 %v264_v40, %v284_v11  ;;  %v455_v20 = vsub.f32 %v427_v38, %v447_v12  ;;  %v458_v23 = vsub.f32 %v430_v52, %v450_v18 }
 0x1ae   :  { %v293_v26 = vsub.f32 %v265_v41, %v285_v15  ;;  %v456_v14 = vsub.f32 %v428_v36, %v448_v22  ;;  %v294_v34 = vsub.f32 %v266_v51, %v286_v28  ;;  %v457_v35 = vsub.f32 %v429_v43, %v449_v32 }
 0x1af   :  { %v295_v21 = vmul.f32 1.442695, %v291_v13  ;;  %v297_v19 = vmul.f32 1.442695, %v292_v17  ;;  %v459_v25 = vmul.f32 1.442695, %v455_v20 }
 0x1b0   :  { %v465_v27 = vmul.f32 1.442695, %v458_v23  ;;  %v299_v29 = vmul.f32 1.442695, %v293_v26  ;;  %v461_v33 = vmul.f32 1.442695, %v456_v14 }
 0x1b1   :  { %704 = vpow2.f32 %v295_v21  ;;  %v301_v36 = vmul.f32 1.442695, %v294_v34  ;;  %v463_v39 = vmul.f32 1.442695, %v457_v35 }
 0x1b2   :  { %706 = vpow2.f32 %v297_v19 }
 0x1b3   :  { %708 = vpow2.f32 %v459_v25 }
 0x1b4   :  { %710 = vpow2.f32 %v465_v27 }
 0x1b5   :  { %712 = vpow2.f32 %v299_v29 }
 0x1b6   :  { %714 = vpow2.f32 %v461_v33 }
 0x1b7   :  { %v1005_v30 = vpop.eup %704  ;;  %716 = vpow2.f32 %v301_v36 }
 0x1b8   :  { %v1007_v31 = vpop.eup %706  ;;  %308 = vperm.xlu0 %699, %v1005_v30   ;;  %718 = vpow2.f32 %v463_v39 }
 0x1b9   :  { %311 = vperm.xlu1 %700, %v1007_v31   ;;  %v1011_v24 = vpop.eup %708 }
 0x1ba   :  { %472 = vperm.xlu2 %701, %v1011_v24   ;;  %v1014_v38 = vpop.eup %710 }
 0x1bb   :  { %v1016_v37 = vpop.eup %712 }
 0x1bc   :  { %v1020_v40 = vpop.eup %714 }
 0x1bd   :  { %v1023_v41 = vpop.eup %716 }
 0x1be   :  { %v1026_v42 = vpop.eup %718 }
 0x1c0   :  { %481 = vperm.xlu0 %699, %v1014_v38  }
 0x1c1   :  { %314 = vperm.xlu1 %700, %v1016_v37  }
 0x1c2   :  { %475 = vperm.xlu2 %701, %v1020_v40  }
 0x1c9   :  { %317 = vperm.xlu1 %700, %v1023_v41  }
 0x1ca   :  { %478 = vperm.xlu2 %701, %v1026_v42  }
 0x214   :  { %v473_v43 = vpop.permute.xlu2 %472 }
 0x215   :  { %v483_v51 = vperm.slane %v473_v43, %v925_v61 }
 0x21c   :  { %v476_v44 = vpop.permute.xlu2 %475 }
 0x21d   :  { %v484_v48 = vperm.slane %v476_v44, %v925_v61 }
 0x21f   :  { %v487_v50 = vsel %vm230_vm1, %v484_v48, %v483_v51 }
 0x224   :  { %v479_v47 = vpop.permute.xlu2 %478 }
 0x225   :  { %v485_v49 = vperm.slane %v479_v47, %v925_v61 }
 0x227   :  { %v488_v55 = vsel %vm232_vm2, %v485_v49, %v487_v50 }
 0x22a   :  { %v309_v45 = vpop.permute.xlu0 %308 }
 0x22b   :  { %v312_v46 = vpop.permute.xlu1 %311  ;;  %v319_v60 = vperm.slane %v309_v45, %v925_v61 }
 0x22c   :  { %v320_v59 = vperm.slane %v312_v46, %v925_v61 }
 0x22e   :  { %v323_v63 = vsel %vm230_vm1, %v320_v59, %v319_v60 }
 0x232   :  { %v482_v52 = vpop.permute.xlu0 %481 }
 0x233   :  { %v315_v53 = vpop.permute.xlu1 %314  ;;  %v486_v54 = vperm.slane %v482_v52, %v925_v61 }
 0x234   :  { %v321_v56 = vperm.slane %v315_v53, %v925_v61 }
 0x235   :  { %v489_v57 = vsel %vm234_vm3, %v486_v54, %v488_v55 }
 0x236   :  { %v491_v58 = vsel %vm249_vm4, %v489_v57, 0.0  ;;  %v324_v7 = vsel %vm232_vm2, %v321_v56, %v323_v63 }
 0x237   :  { %492 = vadd.xlane.f32.xlu1 %v491_v58 }
 0x23b   :  { %v318_v62 = vpop.permute.xlu1 %317 }
 0x23c   :  { %v322_v6 = vperm.slane %v318_v62, %v925_v61 }
 0x23e   :  { %v325_v8 = vsel %vm234_vm3, %v322_v6, %v324_v7 }
 0x23f   :  { %v327_v9 = vsel %vm249_vm4, %v325_v8, 0.0 }
 0x240   :  { %328 = vadd.xlane.f32.xlu2 %v327_v9 }
 0x2aa   :  { %v1045_v11 = vpop.xlane.xlu1 %492 }
 0x2ab   :  { %v496_v12 = vperm.slane %v1045_v11, 1  ;;  %v497_v13 = vperm.slane %v1045_v11, 2 }
 0x2ad   :  { %720 = vrcp.f32 %v496_v12  ;;  %v529_v26 = vand.u32 2147483648, %v496_v12  ;;  %v544_v14 = vand.u32 2147483648, %v497_v13  ;;  %v527_v28 = vand.u32 2147483647, %v496_v12 }
 0x2ae   :  { %722 = vrcp.f32 %v497_v13  ;;  %v542_v32 = vand.u32 2147483647, %v497_v13  ;;  %vm523_vm11 = vweird.f32 %v496_v12  ;;  %vm538_vm12 = vweird.f32 %v497_v13 }
 0x2af   :  { %v530_v39 = vor.u32 1.1754944e-38, %v529_v26  ;;  %v545_v44 = vor.u32 1.1754944e-38, %v544_v14  ;;  %vm528_vm15 = vcmp.eq.f32.partialorder %v527_v28, 8.507059e+37 }
 0x2b0   :  { %vm543_vm0 = vcmp.eq.f32.partialorder %v542_v32, 8.507059e+37 }
 0x2b3   :  { %v329_v17 = vpop.xlane.xlu2 %328  ;;  %v721_v18 = vpop.eup %720 }
 0x2b4   :  { %v331_v15 = vperm.slane %v329_v17, 0  ;;  %v1049_v20 = vperm.slane %v329_v17, 1  ;;  %v1051_v61 = vperm.slane %v329_v17, 2  ;;  %v723_v21 = vpop.eup %722  ;;  %v519_v19 = vmul.f32 %v721_v18, %v496_v12 }
 0x2b5   :  { %v534_v22 = vmul.f32 %v723_v21, %v497_v13  ;;  %vm524_vm9 = vweird.f32 %v721_v18  ;;  %vm539_vm10 = vweird.f32 %v723_v21  ;;  %v1055_v35 = vperm.slane %v329_v17, 3 }
 0x2b6   :  { %724 = vrcp.f32 %v331_v15  ;;  %v520_v23 = vsub.f32 1.0, %v519_v19  ;;  %vm525_vm13 = vmor %vm523_vm11, %vm524_vm9  ;;  %v348_v54 = vand.u32 2147483647, %v331_v15  ;;  %v350_v57 = vand.u32 2147483648, %v331_v15 }
 0x2b7   :  { %726 = vrcp.f32 %v1049_v20  ;;  %v535_v25 = vsub.f32 1.0, %v534_v22  ;;  %vm540_vm14 = vmor %vm538_vm12, %vm539_vm10  ;;  %vm344_vm2 = vweird.f32 %v331_v15  ;;  %v365_v12 = vand.u32 2147483648, %v1049_v20 }
 0x2b8   :  { %728 = vrcp.f32 %v1051_v61  ;;  %v521_v27 = vmul.f32 %v721_v18, %v520_v23  ;;  %vm349_vm4 = vcmp.eq.f32.partialorder %v348_v54, 8.507059e+37  ;;  %v351_v63 = vor.u32 1.1754944e-38, %v350_v57 }
 0x2b9   :  { %v536_v29 = vmul.f32 %v723_v21, %v535_v25  ;;  %730 = vrcp.f32 %v1055_v35  ;;  %vm359_vm6 = vweird.f32 %v1049_v20  ;;  %v363_v17 = vand.u32 2147483647, %v1049_v20 }
 0x2ba   :  { %v522_v33 = vadd.f32 %v721_v18, %v521_v27  ;;  %v366_v19 = vor.u32 1.1754944e-38, %v365_v12  ;;  %v498_v22 = vperm.slane %v1045_v11, 3  ;;  %v380_v26 = vand.u32 2147483648, %v1051_v61 }
 0x2bb   :  { %v537_v36 = vadd.f32 %v723_v21, %v536_v29  ;;  %vm364_vm8 = vcmp.eq.f32.partialorder %v363_v17, 8.507059e+37  ;;  %vm374_vm10 = vweird.f32 %v1051_v61  ;;  %v378_v27 = vand.u32 2147483647, %v1051_v61 }
 0x2bc   :  { %v725_v34 = vpop.eup %724  ;;  %v526_v45 = vsel %vm525_vm13, %v721_v18, %v522_v33  ;;  %v381_v32 = vor.u32 1.1754944e-38, %v380_v26 }
 0x2bd   :  { %v727_v43 = vpop.eup %726  ;;  %v340_v46 = vmul.f32 %v725_v34, %v331_v15  ;;  %v541_v48 = vsel %vm540_vm14, %v723_v21, %v537_v36  ;;  %v531_v49 = vsel %vm528_vm15, %v530_v39, %v526_v45  ;;  %vm345_vm1 = vweird.f32 %v725_v34 }
 0x2be   :  { %v1057_v47 = vpop.eup %728  ;;  %v355_v51 = vmul.f32 %v727_v43, %v1049_v20  ;;  %v546_v52 = vsel %vm543_vm0, %v545_v44, %v541_v48  ;;  %v532_v50 = vmul.f32 %v1020_v40, %v531_v49  ;;  %v1066_v40 = vperm.slane %v1045_v11, 0  ;;  %vm346_vm3 = vmor %vm344_vm2, %vm345_vm1 }
 0x2bf   :  { %v341_v53 = vsub.f32 1.0, %v340_v46  ;;  %v547_v55 = vmul.f32 %v1026_v42, %v546_v52  ;;  %v370_v60 = vmul.f32 %v1057_v47, %v1051_v61  ;;  %vm360_vm5 = vweird.f32 %v727_v43  ;;  %v731_v8 = vpop.eup %730 }
 0x2c0   :  { %v356_v58 = vsub.f32 1.0, %v355_v51  ;;  %613 = vperm.xlu2 %701, %v532_v50   ;;  %732 = vrcp.f32 %v1066_v40  ;;  %vm361_vm7 = vmor %vm359_vm6, %vm360_vm5  ;;  %v385_v21 = vmul.f32 %v731_v8, %v1055_v35  ;;  %vm375_vm9 = vweird.f32 %v1057_v47 }
 0x2c1   :  { %v342_v59 = vmul.f32 %v725_v34, %v341_v53  ;;  %617 = vperm.xlu1 %700, %v547_v55   ;;  %v371_v7 = vsub.f32 1.0, %v370_v60  ;;  %734 = vrcp.f32 %v498_v22  ;;  %vm376_vm11 = vmor %vm374_vm10, %vm375_vm9  ;;  %vm379_vm12 = vcmp.eq.f32.partialorder %v378_v27, 8.507059e+37 }
 0x2c2   :  { %v357_v56 = vmul.f32 %v727_v43, %v356_v58  ;;  %v386_v25 = vsub.f32 1.0, %v385_v21  ;;  %vm390_vm13 = vweird.f32 %v731_v8  ;;  %vm389_vm14 = vweird.f32 %v1055_v35 }
 0x2c3   :  { %v343_v62 = vadd.f32 %v725_v34, %v342_v59  ;;  %v372_v15 = vmul.f32 %v1057_v47, %v371_v7  ;;  %v393_v61 = vand.u32 2147483647, %v1055_v35  ;;  %vm391_vm15 = vmor %vm389_vm14, %vm390_vm13  ;;  %v514_v52 = vand.u32 2147483648, %v1066_v40 }
 0x2c4   :  { %v358_v42 = vadd.f32 %v727_v43, %v357_v56  ;;  %v387_v28 = vmul.f32 %v731_v8, %v386_v25  ;;  %vm508_vm2 = vweird.f32 %v1066_v40  ;;  %v559_v58 = vand.u32 2147483648, %v498_v22 }
 0x2c5   :  { %v347_v6 = vsel %vm346_vm3, %v725_v34, %v343_v62  ;;  %vm394_vm0 = vcmp.eq.f32.partialorder %v393_v61, 8.507059e+37  ;;  %v515_v54 = vor.u32 1.1754944e-38, %v514_v52  ;;  %vm553_vm6 = vweird.f32 %v498_v22 }
 0x2c6   :  { %v352_v9 = vsel %vm349_vm4, %v351_v63, %v347_v6  ;;  %v362_v18 = vsel %vm361_vm7, %v727_v43, %v358_v42  ;;  %v733_v20 = vpop.eup %732  ;;  %v388_v34 = vadd.f32 %v731_v8, %v387_v28  ;;  %v557_v60 = vand.u32 2147483647, %v498_v22 }
 0x2c7   :  { %v353_v13 = vmul.f32 %v1005_v30, %v352_v9  ;;  %v367_v23 = vsel %vm364_vm8, %v366_v19, %v362_v18  ;;  %v373_v30 = vadd.f32 %v1057_v47, %v372_v15  ;;  %v504_v29 = vmul.f32 %v733_v20, %v1066_v40  ;;  %v735_v39 = vpop.eup %734 }
 0x2c8   :  { %v368_v14 = vmul.f32 %v1007_v31, %v367_v23  ;;  %v395_v31 = vand.u32 2147483648, %v1055_v35  ;;  %v392_v44 = vsel %vm391_vm15, %v731_v8, %v388_v34  ;;  %v549_v46 = vmul.f32 %v735_v39, %v498_v22 }
 0x2c9   :  { %565 = vperm.xlu0 %699, %v353_v13   ;;  %v377_v11 = vsel %vm376_vm11, %v1057_v47, %v373_v30  ;;  %v505_v36 = vsub.f32 1.0, %v504_v29  ;;  %vm509_vm1 = vweird.f32 %v733_v20  ;;  %vm554_vm5 = vweird.f32 %v735_v39 }
 0x2ca   :  { %v382_v33 = vsel %vm379_vm12, %v381_v32, %v377_v11  ;;  %v396_v47 = vor.u32 1.1754944e-38, %v395_v31  ;;  %v550_v51 = vsub.f32 1.0, %v549_v46  ;;  %vm510_vm3 = vmor %vm508_vm2, %vm509_vm1  ;;  %v560_v56 = vor.u32 1.1754944e-38, %v559_v58 }
 0x2cb   :  { %v383_v43 = vmul.f32 %v1016_v37, %v382_v33  ;;  %v506_v45 = vmul.f32 %v733_v20, %v505_v36  ;;  %v512_v37 = vand.u32 2147483647, %v1066_v40  ;;  %vm555_vm7 = vmor %vm553_vm6, %vm554_vm5  ;;  %vm558_vm8 = vcmp.eq.f32.partialorder %v557_v60, 8.507059e+37 }
 0x2cc   :  { %v397_v48 = vsel %vm394_vm0, %v396_v47, %v392_v44  ;;  %v551_v53 = vmul.f32 %v735_v39, %v550_v51  ;;  %v845_v63 = vmov 839922192  }
 0x2cd   :  { %v507_v49 = vadd.f32 %v733_v20, %v506_v45  ;;  %v398_v50 = vmul.f32 %v1023_v41, %v397_v48  ;;  %vm513_vm4 = vcmp.eq.f32.partialorder %v512_v37, 8.507059e+37  ;;  %v580_v6 = vunpack.c.l.s4 %v845_v63 }
 0x2ce   :  { %v552_v57 = vadd.f32 %v735_v39, %v551_v53 }
 0x2cf   :  { %v511_v35 = vsel %vm510_vm3, %v733_v20, %v507_v49  ;;  %v581_v42 = vunpack.c.0.s8 %v580_v6 }
 0x2d0   :  { %v516_v55 = vsel %vm513_vm4, %v515_v54, %v511_v35  ;;  %v556_v41 = vsel %vm555_vm7, %v735_v39, %v552_v57 }
 0x2d1   :  { %569 = vperm.xlu0 %699, %v368_v14   ;;  %v517_v59 = vmul.f32 %v1011_v24, %v516_v55  ;;  %v561_v62 = vsel %vm558_vm8, %v560_v56, %v556_v41 }
 0x2d2   :  { %v562_v40 = vmul.f32 %v1014_v38, %v561_v62 }
 0x2d9   :  { %573 = vperm.xlu0 %699, %v383_v43  }
 0x2e1   :  { %577 = vperm.xlu0 %699, %v398_v50  }
 0x2e9   :  { %609 = vperm.xlu0 %699, %v517_v59  }
 0x2f1   :  { %621 = vperm.xlu0 %699, %v562_v40  }
 0x31a   :  { %v614_v7 = vpop.permute.xlu2 %613 }
 0x31b   :  { %v630_v8 = vperm.slane %v614_v7, %v581_v42 }
 0x31d   :  { %v644_v9 = vmul.f32 %v630_v8, %v904_v10 }
 0x31f   :  { %648 = vst [vmem:[#allocation9 + $0x8] sm:$0xff] %v644_v9 }
 0x333   :  { %v618_v24 = vpop.permute.xlu1 %617 }
 0x334   :  { %v634_v12 = vperm.slane %v618_v24, %v581_v42 }
 0x336   :  { %v645_v13 = vmul.f32 %v634_v12, %v899_v5 }
 0x338   :  { %649 = vst [vmem:[#allocation9 + $0x10] sm:$0xff] %v645_v13 }
 0x33b   :  { %v566_v17 = vpop.permute.xlu0 %565 }
 0x33c   :  { %v582_v18 = vperm.slane %v566_v17, %v581_v42 }
 0x33e   :  { %v599_v15 = vmul.f32 %v582_v18, %v885_v0 }
 0x340   :  { %603 = vst [vmem:[#allocation8] sm:$0xff] %v599_v15 }
 0x343   :  { %v570_v38 = vpop.permute.xlu0 %569 }
 0x344   :  { %v586_v21 = vperm.slane %v570_v38, %v581_v42 }
 0x346   :  { %v600_v19 = vmul.f32 %v586_v21, %v890_v2 }
 0x348   :  { %604 = vst [vmem:[#allocation8 + $0x8] sm:$0xff] %v600_v19 }
 0x34b   :  { %v574_v22 = vpop.permute.xlu0 %573 }
 0x34c   :  { %v590_v23 = vperm.slane %v574_v22, %v581_v42 }
 0x34e   :  { %v601_v10 = vmul.f32 %v590_v23, %v887_v1 }
 0x350   :  { %605 = vst [vmem:[#allocation8 + $0x10] sm:$0xff] %v601_v10 }
 0x353   :  { %v578_v30 = vpop.permute.xlu0 %577 }
 0x354   :  { %v594_v5 = vperm.slane %v578_v30, %v581_v42 }
 0x356   :  { %v602_v0 = vmul.f32 %v594_v5, %v893_v3 }
 0x358   :  { %606 = vst [vmem:[#allocation8 + $0x18] sm:$0xff] %v602_v0 }
 0x359   :  { %663 = dma.vmem_to_hbm [thread:$0]  %s656_s29, 512, %s658_s6, [#allocation5], %s841_s23, %s841_s23, %s842_s24  }
 0x35b   :  { %v610_v2 = vpop.permute.xlu0 %609 }
 0x35c   :  { %v626_v1 = vperm.slane %v610_v2, %v581_v42 }
 0x35e   :  { %v643_v25 = vmul.f32 %v626_v1, %v897_v4 }
 0x360   :  { %647 = vst [vmem:[#allocation9] sm:$0xff] %v643_v25 }
 0x363   :  { %v622_v20 = vpop.permute.xlu0 %621 }
 0x364   :  { %v638_v3 = vperm.slane %v622_v20, %v581_v42 }
 0x366   :  { %v646_v26 = vmul.f32 %v638_v3, %v909_v16 }
 0x368   :  { %650 = vst [vmem:[#allocation9 + $0x18] sm:$0xff] %v646_v26 }
 0x369   :  { %676 = dma.vmem_to_hbm [thread:$0]  %s669_s8, 512, %s671_s10, [#allocation10], %s841_s23, %s841_s23, %s842_s24  }
 0x36a   :  { %836 = dma.done.wait [#allocation5], 512  }
 0x36b   :  { %837 = vsyncadd [#allocation5], 4294966784 }
 0x36c   :  { %838 = dma.done.wait [#allocation10], 512  }
 0x36d   :  { %839 = vsyncadd [#allocation10], 4294966784 }
 0x36e   :  { %685 = vsyncpa [#allocation4], 1 }
 0x36f   :  { %686 = vsyncpa [#allocation7], 1 }
 0x370   :  { %687 = vsyncpa [#allocation5], 1 }
 0x371   :  { %688 = vsyncpa [#allocation10], 1 }

</bundles_post_ra>
